<compile_context>
chip_gen: v7x
topology: tpu7x:2x2x1
jax: 0.10.0
libtpu: 0.0.40
codegen_flags: <defaults>
</compile_context>

<pallas_src>
import math

import jax
import jax.numpy as jnp
from jax import lax
from jax.experimental import pallas as pl
from jax.experimental.pallas import tpu as pltpu


def _round_up(a, b):
    return ((a + b - 1) // b) * b


def _cdiv(a, b):
    return (a + b - 1) // b


def _sublane(dtype):
    # Second-minor tiling requirement: 8 rows (f32), 16 (bf16), 32 (int8/fp8).
    return max(8, 32 // jnp.dtype(dtype).itemsize)


# x:(tm,tk) contracted with W:(tn,tk) over their last dims  ->  (tm,tn)
_CONTRACT_DIMS = (((1,), (1,)), ((), ()))


def _linear_kernel_f32out(x_ref, w_ref, b_ref, o_ref):
    """Accumulate x @ W.T (+ bias on the first K step) directly in the f32 output tile."""
    k = pl.program_id(2)
    part = lax.dot_general(
        x_ref[...], w_ref[...], _CONTRACT_DIMS, preferred_element_type=jnp.float32
    )

    @pl.when(k == 0)
    def _():
        o_ref[...] = part + b_ref[...]

    @pl.when(k > 0)
    def _():
        o_ref[...] += part


def _linear_kernel_acc(x_ref, w_ref, b_ref, o_ref, acc_ref):
    """Same contraction, f32 scratch accumulator for non-f32 output dtypes."""
    k = pl.program_id(2)
    part = lax.dot_general(
        x_ref[...], w_ref[...], _CONTRACT_DIMS, preferred_element_type=jnp.float32
    )

    @pl.when(k == 0)
    def _():
        acc_ref[...] = part + b_ref[...]

    @pl.when(k > 0)
    def _():
        acc_ref[...] += part

    @pl.when(k == pl.num_programs(2) - 1)
    def _():
        o_ref[...] = acc_ref[...].astype(o_ref.dtype)


def linear_zeros(x, weight, bias, *, compute_dtype=None,
                 tm_max=512, tn_max=512, tk_max=None):
    """Forward of LinearZeros: y = x @ weight.T + bias.

    x:      (..., in_channels)
    weight: (out_channels, in_channels)   (PyTorch nn.Linear layout, NOT transposed here)
    bias:   (out_channels,)
    compute_dtype: optional MXU operand dtype (e.g. jnp.bfloat16) for the fast path;
        accumulation stays f32 and the output keeps x.dtype, but results differ from
        the exact f32 reference at ~1e-2 relative level.
    returns (..., out_channels) with dtype == x.dtype.
    """
    *lead, K = x.shape
    N, K_w = weight.shape
    assert K == K_w, (K, K_w)
    M = math.prod(lead) if lead else 1
    out_dtype = x.dtype

    x2 = x.reshape(M, K)
    w = weight  # keep (N, K); no HBM transpose round trip
    if compute_dtype is not None and jnp.dtype(compute_dtype) != x2.dtype:
        x2 = x2.astype(compute_dtype)
        w = w.astype(compute_dtype)
    b2 = bias.astype(jnp.float32).reshape(1, N)

    in_dtype = x2.dtype
    item = jnp.dtype(in_dtype).itemsize
    sub = _sublane(in_dtype)
    if tk_max is None:
        tk_max = 2048 if item <= 2 else 1024

    # ---- tile selection: no M/N padding; K padded with zeros only if unavoidable ----
    tm = tm_max if M >= tm_max else _round_up(M, sub)
    if N >= tn_max:
        tn = tn_max
    elif N >= 128:
        tn = _round_up(N, 128)
    else:
        tn = N  # full (small) output dim

    if K <= tk_max:
        tk, Kp = K, K                       # single K step, no 128-lane padding
    else:
        tkc = max(128, (tk_max // 128) * 128)
        tk = next((c for c in range(tkc, 127, -128) if K % c == 0), tkc)
        Kp = _round_up(K, tk)

    if Kp != K:
        # Only the contraction tail needs real zeros for correctness.
        x2 = jnp.pad(x2, ((0, 0), (0, Kp - K)))
        w = jnp.pad(w, ((0, 0), (0, Kp - K)))

    grid_m, grid_n = _cdiv(M, tm), _cdiv(N, tn)
    # v7x has 2 TensorCores: make sure a "parallel" axis has >=2 blocks for
    # non-trivial problems so both cores get work.
    if grid_m == 1 and grid_n == 1:
        if N >= 256:
            tn = _round_up(_cdiv(N, 2), 128)
            grid_n = _cdiv(N, tn)
        elif M >= 256:
            tm = _round_up(_cdiv(M, 2), sub)
            grid_m = _cdiv(M, tm)
    grid_k = Kp // tk

    use_acc = out_dtype != jnp.float32
    kernel = _linear_kernel_acc if use_acc else _linear_kernel_f32out
    scratch = (pltpu.VMEM((tm, tn), jnp.float32),) if use_acc else ()

    # Double-buffered tiles (x, W, out, bias) + optional f32 scratch; cap at 48 MiB so
    # the budget always fits v7x's 64 MiB physical VMEM with headroom.
    vmem_bytes = (2 * (tm * tk + tn * tk) * item
                  + 2 * tm * tn * jnp.dtype(out_dtype).itemsize
                  + 2 * tn * 4
                  + (tm * tn * 4 if use_acc else 0))
    vmem_limit = min(max(2 * vmem_bytes, 32 * 1024 * 1024), 48 * 1024 * 1024)

    out = pl.pallas_call(
        kernel,
        out_shape=jax.ShapeDtypeStruct((M, N), out_dtype),
        grid_spec=pltpu.PrefetchScalarGridSpec(
            num_scalar_prefetch=0,
            grid=(grid_m, grid_n, grid_k),
            in_specs=[
                pl.BlockSpec((tm, tk), lambda i, j, k: (i, k)),   # x tile
                pl.BlockSpec((tn, tk), lambda i, j, k: (j, k)),   # W tile, (N,K) layout
                pl.BlockSpec((1, tn), lambda i, j, k: (0, j)),    # bias tile (f32)
            ],
            out_specs=pl.BlockSpec((tm, tn), lambda i, j, k: (i, j)),
            scratch_shapes=scratch,
        ),
        compiler_params=pltpu.CompilerParams(
            dimension_semantics=("parallel", "parallel", "arbitrary"),
            vmem_limit_bytes=vmem_limit,
        ),
    )(x2, w, b2)

    return out.reshape(*lead, N)


if __name__ == "__main__":
    key = jax.random.PRNGKey(0)
    k_x, k_w, k_b, k_x2, k_w2, k_b2 = jax.random.split(key, 6)

    # 1) Module semantics: zero-initialized weight & bias -> all-zero output.
    B, S, Cin, Cout = 2, 8, 32, 64
    x = jax.random.normal(k_x, (B, S, Cin), dtype=jnp.float32)
    w0 = jnp.zeros((Cout, Cin), dtype=jnp.float32)
    b0 = jnp.zeros((Cout,), dtype=jnp.float32)
    y0 = jax.block_until_ready(linear_zeros(x, w0, b0))
    assert y0.shape == (B, S, Cout), y0.shape
    if not jnp.allclose(y0, 0.0):
        raise AssertionError("LinearZeros with zero params must return all zeros")

    # 2) General linear path with non-zero params (single-block grid), f32.
    w1 = 0.1 * jax.random.normal(k_w, (Cout, Cin), dtype=jnp.float32)
    b1 = 0.1 * jax.random.normal(k_b, (Cout,), dtype=jnp.float32)
    y1 = jax.block_until_ready(linear_zeros(x, w1, b1))
    ref1 = jnp.einsum("bsk,nk->bsn", x, w1) + b1
    if not jnp.allclose(y1, ref1, atol=1e-5, rtol=1e-5):
        raise AssertionError("f32 small-shape result mismatch vs reference")

    # 3) Multi-step K reduction + >=2 parallel blocks (forced small tk), f32.
    B2, S2, Cin2, Cout2 = 4, 32, 384, 256
    xb = jax.random.normal(k_x2, (B2, S2, Cin2), dtype=jnp.float32)
    wb = 0.05 * jax.random.normal(k_w2, (Cout2, Cin2), dtype=jnp.float32)
    bb = 0.1 * jax.random.normal(k_b2, (Cout2,), dtype=jnp.float32)
    y_tiled = jax.block_until_ready(linear_zeros(xb, wb, bb, tk_max=128))
    y_single = jax.block_until_ready(linear_zeros(xb, wb, bb))
    ref2 = jnp.einsum("bsk,nk->bsn", xb, wb) + bb
    if not jnp.allclose(y_tiled, y_single, atol=1e-5, rtol=1e-5):
        raise AssertionError("tiled-K result differs from single-block result")
    if not jnp.allclose(y_tiled, ref2, atol=2e-2, rtol=2e-2):
        raise AssertionError("f32 tiled-K result mismatch vs reference")

    # 4) bf16 MXU fast path (f32 accumulation), relaxed tolerance.
    y_bf = jax.block_until_ready(linear_zeros(xb, wb, bb, compute_dtype=jnp.bfloat16))
    if not jnp.allclose(y_bf, ref2, atol=5e-2, rtol=5e-2):
        raise AssertionError("bf16-compute result mismatch vs reference")

    # 5) bf16 input/output path (exercises the scratch-accumulator kernel variant).
    y_bfio = jax.block_until_ready(
        linear_zeros(xb.astype(jnp.bfloat16), wb.astype(jnp.bfloat16), bb, tk_max=128))
    if not jnp.allclose(y_bfio.astype(jnp.float32), ref2, atol=1e-1, rtol=1e-1):
        raise AssertionError("bf16 in/out result mismatch vs reference")

    print("KERNEL_OK")
</pallas_src>

<mosaic_0001>
module attributes {stable_mosaic.version = 11 : i64} {
  func.func @_linear_kernel_f32out(%arg0: i32, %arg1: i32, %arg2: i32, %arg3: memref<16x32xf32, #tpu.memory_space<vmem>>, %arg4: memref<64x32xf32, #tpu.memory_space<vmem>>, %arg5: memref<1x64xf32, #tpu.memory_space<vmem>>, %arg6: memref<16x64xf32, #tpu.memory_space<vmem>>) attributes {dimension_semantics = [#tpu.dimension_semantics<parallel>, #tpu.dimension_semantics<parallel>, #tpu.dimension_semantics<arbitrary>], iteration_bounds = array<i64: 1, 1, 1>, scalar_prefetch = 0 : i64, scratch_operands = 0 : i64, tpu.core_type = #tpu.core_type<tc>, window_params = [{transform_indices = @transform_0, window_bounds = array<i64: 16, 32>}, {transform_indices = @transform_1, window_bounds = array<i64: 64, 32>}, {transform_indices = @transform_2, window_bounds = array<i64: 1, 64>}, {transform_indices = @transform_3, window_bounds = array<i64: 16, 64>}]} {
    %c0 = arith.constant 0 : index
    %c0_0 = arith.constant 0 : index
    %0 = vector.load %arg3[%c0, %c0_0] : memref<16x32xf32, #tpu.memory_space<vmem>>, vector<16x32xf32>
    %c0_1 = arith.constant 0 : index
    %c0_2 = arith.constant 0 : index
    %1 = vector.load %arg4[%c0_1, %c0_2] : memref<64x32xf32, #tpu.memory_space<vmem>>, vector<64x32xf32>
    %cst = arith.constant dense<0.000000e+00> : vector<16x64xf32>
    %2 = tpu.matmul %0, %1, %cst {dimension_numbers = #tpu.dot_dimension_numbers<[1], [1], [0], [0], [0, 0, 1, 0], [], []>} : vector<16x32xf32>, vector<64x32xf32>, vector<16x64xf32> -> vector<16x64xf32>
    %c0_i32 = arith.constant 0 : i32
    %3 = arith.cmpi eq, %arg2, %c0_i32 : i32
    %4 = arith.extui %3 : i1 to i32
    %c0_i32_3 = arith.constant 0 : i32
    %5 = arith.cmpi ne, %4, %c0_i32_3 : i32
    scf.if %5 {
      %c0_6 = arith.constant 0 : index
      %c0_7 = arith.constant 0 : index
      %9 = vector.load %arg5[%c0_6, %c0_7] : memref<1x64xf32, #tpu.memory_space<vmem>>, vector<1x64xf32>
      %10 = vector.broadcast %9 : vector<1x64xf32> to vector<16x64xf32>
      %11 = arith.addf %2, %10 : vector<16x64xf32>
      %c0_8 = arith.constant 0 : index
      %c0_9 = arith.constant 0 : index
      %12 = vector.load %arg6[%c0_8, %c0_9] : memref<16x64xf32, #tpu.memory_space<vmem>>, vector<16x64xf32>
      tpu.vector_store %arg6[%c0_8, %c0_9], %11 {strides = array<i32>} : memref<16x64xf32, #tpu.memory_space<vmem>>, vector<16x64xf32>,
    } else {
    }
    %c0_i32_4 = arith.constant 0 : i32
    %6 = arith.cmpi sgt, %arg2, %c0_i32_4 : i32
    %7 = arith.extui %6 : i1 to i32
    %c0_i32_5 = arith.constant 0 : i32
    %8 = arith.cmpi ne, %7, %c0_i32_5 : i32
    scf.if %8 {
      %c0_6 = arith.constant 0 : index
      %c0_7 = arith.constant 0 : index
      %9 = vector.load %arg6[%c0_6, %c0_7] : memref<16x64xf32, #tpu.memory_space<vmem>>, vector<16x64xf32>
      %10 = arith.addf %9, %2 : vector<16x64xf32>
      %c0_8 = arith.constant 0 : index
      %c0_9 = arith.constant 0 : index
      %11 = vector.load %arg6[%c0_8, %c0_9] : memref<16x64xf32, #tpu.memory_space<vmem>>, vector<16x64xf32>
      tpu.vector_store %arg6[%c0_8, %c0_9], %10 {strides = array<i32>} : memref<16x64xf32, #tpu.memory_space<vmem>>, vector<16x64xf32>,
    } else {
    }
    return
  }
  func.func @transform_0(%arg0: i32, %arg1: i32, %arg2: i32) -> (i32, i32) {
    %c0_i32 = arith.constant 0 : i32
    return %arg0, %arg2 : i32, i32
  }
  func.func @transform_1(%arg0: i32, %arg1: i32, %arg2: i32) -> (i32, i32) {
    %c0_i32 = arith.constant 0 : i32
    return %arg1, %arg2 : i32, i32
  }
  func.func @transform_2(%arg0: i32, %arg1: i32, %arg2: i32) -> (i32, i32) {
    %c0_i32 = arith.constant 0 : i32
    %c0_i32_0 = arith.constant 0 : i32
    return %c0_i32, %arg1 : i32, i32
  }
  func.func @transform_3(%arg0: i32, %arg1: i32, %arg2: i32) -> (i32, i32) {
    %c0_i32 = arith.constant 0 : i32
    return %arg0, %arg1 : i32, i32
  }
}

</mosaic_0001>

<bundles_post_ra>
// kernel: tpu_custom_call.1
= control target key start
LH: loop header
LB: loop body
LE: loop exit
PB: predicated region body
PF: predicated region fallthrough
CT: control target
= control target key end

     0   :  { %vm25_vm0 = vcmask 261120   ;;  %s357_s0 = inlined_call_operand.vmem [shape: f32[16,32], index: 0, kind: input, shape index: {}]   ;;  %s358_s1 = inlined_call_operand.vmem [shape: f32[64,32], index: 1, kind: input, shape index: {}]   ;;  %s359_s2 = inlined_call_operand.vmem [shape: f32[1,64], index: 2, kind: input, shape index: {}]   ;;  %s360_s3 = inlined_call_operand.hbm [shape: f32[16,64], index: 3, kind: output, shape index: {}]  }
   0x1   :  { %v17_v0 = vld [vmem:[%s358_s1] sm:$0xff]  ;;  %v18_v1 = vld [vmem:[%s358_s1 + $0x8] sm:$0xff]  ;;  %v19_v2 = vld [vmem:[%s358_s1 + $0x10] sm:$0xff] }
   0x2   :  { %v214_v3 = vpack.c.bf16 %v18_v1, %v17_v0  ;;  %vm299_vm1 = vmpackc.low %vm25_vm0, %vm25_vm0  ;;  %v20_v5 = vld [vmem:[%s358_s1 + $0x18] sm:$0xff]  ;;  %v15_v7 = vld [vmem:[%s357_s0] sm:$0xff] }
   0x3   :  { %v220_v6 = vpack.c.bf16 %v20_v5, %v19_v2 }
   0x4   :  { %216 = vmatprep.subr.msk.bf16.mxu0 %vm299_vm1, %v214_v3 }
   0x5   :  { %8 = vsyncpa [#allocation3], 0  ;;  %219 = vmatpush3.bf16.xpose.msk.msra.mxu0 %vm299_vm1, %v214_v3  ;;  %211 = vmatprep.mubr.msk.f32.mxu0 %vm25_vm0, %v15_v7  ;;  %v21_v8 = vld [vmem:[%s358_s1 + $0x20] sm:$0xff]  ;;  %v22_v9 = vld [vmem:[%s358_s1 + $0x28] sm:$0xff]  ;;  %vm144_vm2 = vcmask 523264  }
   0x6   :  { %222 = vmatprep.subr.msk.bf16.mxu0 %vm299_vm1, %v220_v6  ;;  %v226_v10 = vpack.c.bf16 %v22_v9, %v21_v8  ;;  %v23_v11 = vld [vmem:[%s358_s1 + $0x30] sm:$0xff]  ;;  %v24_v12 = vld [vmem:[%s358_s1 + $0x38] sm:$0xff]  ;;  %v16_v14 = vld [vmem:[%s357_s0 + $0x8] sm:$0xff]  ;;  %s265_s1 = smov [#allocation2]  }
   0x7   :  { %v232_v13 = vpack.c.bf16 %v24_v12, %v23_v11  ;;  %v184_v15 = vld [vmem:[%s359_s2] ss:$0 sm:$0xff]  ;;  %s163_s7 = sshll.u32 %s265_s1, 4  ;;  %s164_s7 = int_to_ptr.vmem [resolvable:$true] %s163_s7 }
   0x8   :  { %s241_s8 = scalar_lea.vmem %s164_s7, 256  ;;  %p246_p1 = scmp.lt.s32.totalorder %s164_s7, %s164_s7 }
   0x9   :  { %p242_p0 = scmp.ne.s32.totalorder %s164_s7, %s241_s8  ;;  %p247_p2 = scmp.lt.s32.totalorder %s241_s8, %s241_s8 }
   0xb   :  { %p248_p3 = por %p247_p2, %p246_p1 }
   0xd   :  { %225 = vmatpush3.bf16.xpose.msk.msra.mxu0 %vm299_vm1, %v220_v6  ;;  %p249_p4 = pnand %p248_p3, %p242_p0 }
   0xe   :  { %228 = vmatprep.subr.msk.bf16.mxu0 %vm299_vm1, %v226_v10 }
  0x15   :  { %231 = vmatpush3.bf16.xpose.msk.msra.mxu0 %vm299_vm1, %v226_v10 }
  0x16   :  { %234 = vmatprep.subr.msk.bf16.mxu0 %vm299_vm1, %v232_v13 }
  0x1d   :  { %237 = vmatpush3.bf16.xpose.msk.msra.mxu0 %vm299_vm1, %v232_v13 }
  0x24   :  { %212 = vmatmul.mubr.msk.f32.vlgmr.msra.gmra.mrb[0].mxu0 %vm25_vm0, %v16_v14 }
  0xf7   :  { %v213_v16 = vpop.f32.mrb[0].mxu0 }
  0xf8   :  { %v143_v17 = vadd.f32 %v213_v16, %v184_v15  ;;  %v122_v18 = vpop.f32.mrb[1].mxu0 }
  0xf9   :  { %v142_v19 = vadd.f32 %v184_v15, %v122_v18 }
  0xfa   :  { %146 = vst.msk [vmem:[#allocation2 + $0x8] sm:$0xff] %vm144_vm2, %v143_v17 }
  0xfb   :  { %145 = vst.msk [vmem:[#allocation2] sm:$0xff] %vm144_vm2, %v142_v19 }
  0xfc   :  { %252 = shalt.err (!%p249_p4)
}
  0xfd   :  { %s253_s2 = scalar_lea.hbm %s360_s3, 256 }
  0xfe   :  { %p254_p5 = scmp.ne.s32.totalorder %s360_s3, %s253_s2  ;;  %p257_p6 = scmp.lt.u32.totalorder %s253_s2, %s360_s3 }
 0x100   :  { %p259_p7 = pnand %p257_p6, %p254_p5 }
 0x102   :  { %262 = shalt.err (!%p259_p7)
}
 0x103   :  { %s266_s14 = smov 128   ;;  %s267_s15 = smov 8  }
 0x104   :  { %169 = dma.vmem_to_hbm [thread:$0]  %s164_s7, 256, %s360_s3, [#allocation3], %s266_s14, %s266_s14, %s267_s15  }
 0x105   :  { %263 = dma.done.wait [#allocation3], 256  }
 0x106   :  { %264 = vsyncadd [#allocation3], 4294967040 }
 0x107   :  { %173 = vsyncpa [#allocation3], 1 }

</bundles_post_ra>
